<compile_context>
chip_gen: v7x
topology: tpu7x:2x2x1
jax: 0.10.0
libtpu: 0.0.40
codegen_flags: <defaults>
</compile_context>

<pallas_src>
import functools

import jax
import jax.numpy as jnp
from jax.experimental import pallas as pl
from jax.experimental.pallas import tpu as pltpu


def _leaky_where_kernel(x_ref, o_ref, *, negative_slope):
    x = x_ref[...]
    o_ref[...] = jnp.where(x > 0, x, x * negative_slope)


def _block_bytes_target() -> int:
    """Per-buffer block-size target, tuned per TPU generation.

    Double-buffered input + output => 4x this many pipelined VMEM bytes, kept
    under every generation's *default* scoped-VMEM limit (16 MiB on v5e,
    32 MiB on v6e/v7x) so no vmem_limit_bytes override is required.
    """
    try:
        kind = jax.devices()[0].device_kind.lower()
    except Exception:  # pragma: no cover - defensive; fall through to default
        kind = ""
    if "v5" in kind:
        return 2 << 20   # v5e: 8 MiB total pipelined VMEM
    return 4 << 20       # v6e / v7x / other: 16 MiB total pipelined VMEM


def _pick_lane(n: int):
    """Largest lane width (multiple of 128) that divides n exactly (no padding)."""
    for lane in (1024, 512, 256, 128):
        if n % lane == 0:
            return lane
    return None


def _pick_block_rows(rows: int, lane: int, itemsize: int) -> int:
    # Dtype-dependent minimum sublane tile: f32 -> 8, bf16 -> 16, int8/fp8 -> 32.
    sub = 8 * max(1, 4 // max(1, itemsize))
    target = max(sub, (_block_bytes_target() // (lane * itemsize) // sub) * sub)
    # Keep >= 2 grid steps when possible so the "parallel" axis can shard
    # across both TensorCores on v7x (harmless on single-TC v5e/v6e).
    if rows > sub:
        half = max(sub, ((rows // 2) // sub) * sub)
        target = min(target, half)
    block_rows = min(target, rows)
    # Pallas rule: block dims must be a multiple of the sublane tile or equal
    # the full array dim.
    if block_rows != rows and block_rows % sub != 0:
        block_rows = rows
    return block_rows


def model_forward(x1: jax.Array, negative_slope: float,
                  min_pallas_elements: int = 1024) -> jax.Array:
    """Reproduces Model.forward:
        v1 = x1.reshape(B, -1); v2 = where(v1 > 0, v1, v1 * slope); v2.reshape(x1.shape)
    Elementwise, so we are free to choose a TPU-friendly layout."""
    orig_shape = x1.shape
    n = x1.size

    # Tiny inputs: XLA already fuses this into a single HBM pass; pallas_call
    # launch overhead would dominate.
    if n < min_pallas_elements:
        return jnp.where(x1 > 0, x1, x1 * negative_slope)

    lane = _pick_lane(n)
    if lane is None:
        # TODO(synk): sizes not divisible by 128 use the fused XLA elementwise
        # (a Pallas path would need a pad + slice, i.e. two extra HBM passes).
        return jnp.where(x1 > 0, x1, x1 * negative_slope)

    rows = n // lane
    v = x1.reshape(rows, lane)  # free bitcast: lane-dense 2D view, no padding

    itemsize = jnp.dtype(x1.dtype).itemsize
    block_rows = _pick_block_rows(rows, lane, itemsize)
    grid = (pl.cdiv(rows, block_rows),)  # ragged last block masked by Pallas

    out = pl.pallas_call(
        functools.partial(_leaky_where_kernel, negative_slope=negative_slope),
        out_shape=jax.ShapeDtypeStruct((rows, lane), v.dtype),
        grid_spec=pl.GridSpec(
            grid=grid,
            in_specs=[pl.BlockSpec((block_rows, lane), lambda i: (i, 0))],
            out_specs=pl.BlockSpec((block_rows, lane), lambda i: (i, 0)),
        ),
        compiler_params=pltpu.CompilerParams(
            dimension_semantics=("parallel",),
        ),
    )(v)

    # Same element order, so restoring the original NCHW shape is a free bitcast.
    return out.reshape(orig_shape)


if __name__ == "__main__":
    key = jax.random.PRNGKey(0)
    negative_slope = 0.01
    k1, k2 = jax.random.split(key)

    ok = True

    # Shape from the original module spec (6144 elems = 6 x 1024, single block).
    x_a = jax.random.normal(k1, (2, 3, 32, 32), dtype=jnp.float32)
    out_a = model_forward(x_a, negative_slope)
    jax.block_until_ready(out_a)
    ref_a = jnp.where(x_a > 0, x_a, x_a * negative_slope)
    ok &= out_a.shape == x_a.shape
    ok &= bool(jnp.allclose(out_a, ref_a, atol=1e-6))

    # Second small shape exercising a multi-step grid with a ragged last block
    # (16000 elems -> lane=128, rows=125, block_rows=56, grid=3).
    x_b = jax.random.normal(k2, (2, 5, 40, 40), dtype=jnp.float32)
    out_b = model_forward(x_b, negative_slope)
    jax.block_until_ready(out_b)
    ref_b = jnp.where(x_b > 0, x_b, x_b * negative_slope)
    ok &= out_b.shape == x_b.shape
    ok &= bool(jnp.allclose(out_b, ref_b, atol=1e-6))

    assert ok, "mismatch vs reference"
    print("KERNEL_OK")
</pallas_src>

<mosaic_0001>
module attributes {stable_mosaic.version = 11 : i64} {
  func.func @_leaky_where_kernel(%arg0: i32, %arg1: memref<6x1024xf32, #tpu.memory_space<vmem>>, %arg2: memref<6x1024xf32, #tpu.memory_space<vmem>>) attributes {dimension_semantics = [#tpu.dimension_semantics<parallel>], iteration_bounds = array<i64: 1>, scalar_prefetch = 0 : i64, scratch_operands = 0 : i64, tpu.core_type = #tpu.core_type<tc>, window_params = [{transform_indices = @transform_0, window_bounds = array<i64: 6, 1024>}, {transform_indices = @transform_1, window_bounds = array<i64: 6, 1024>}]} {
    %c0 = arith.constant 0 : index
    %c0_0 = arith.constant 0 : index
    %0 = vector.load %arg1[%c0, %c0_0] : memref<6x1024xf32, #tpu.memory_space<vmem>>, vector<6x1024xf32>
    %cst = arith.constant 0.000000e+00 : f32
    %1 = vector.broadcast %cst : f32 to vector<6x1024xf32>
    %2 = arith.cmpf ogt, %0, %1 : vector<6x1024xf32>
    %cst_1 = arith.constant 0.00999999977 : f32
    %3 = vector.broadcast %cst_1 : f32 to vector<6x1024xf32>
    %4 = arith.mulf %0, %3 : vector<6x1024xf32>
    %5 = arith.select %2, %0, %4 : vector<6x1024xi1>, vector<6x1024xf32>
    %c0_2 = arith.constant 0 : index
    %c0_3 = arith.constant 0 : index
    %6 = vector.load %arg2[%c0_2, %c0_3] : memref<6x1024xf32, #tpu.memory_space<vmem>>, vector<6x1024xf32>
    tpu.vector_store %arg2[%c0_2, %c0_3], %5 {strides = array<i32>} : memref<6x1024xf32, #tpu.memory_space<vmem>>, vector<6x1024xf32>,
    return
  }
  func.func @transform_0(%arg0: i32) -> (i32, i32) {
    %c0_i32 = arith.constant 0 : i32
    %c0_i32_0 = arith.constant 0 : i32
    return %arg0, %c0_i32 : i32, i32
  }
  func.func @transform_1(%arg0: i32) -> (i32, i32) {
    %c0_i32 = arith.constant 0 : i32
    %c0_i32_0 = arith.constant 0 : i32
    return %arg0, %c0_i32 : i32, i32
  }
}

</mosaic_0001>

<bundles_post_ra>
// kernel: tpu_custom_call.1
= control target key start
LH: loop header
LB: loop body
LE: loop exit
PB: predicated region body
PF: predicated region fallthrough
CT: control target
= control target key end

     0   :  { %6 = vsyncpa [#allocation3], 0  ;;  %s162_s0 = inlined_call_operand.hbm [shape: f32[6,1024], index: 0, kind: input, shape index: {}]   ;;  %s163_s1 = inlined_call_operand.hbm [shape: f32[6,1024], index: 1, kind: output, shape index: {}]  }
   0x1   :  { %7 = vsyncpa [#allocation4], 0  ;;  %s126_s6 = smov [#allocation2]   ;;  %s78_s10 = scalar_lea.hbm %s162_s0, 1024 }
   0x2   :  { %s14_s7 = sshll.u32 %s126_s6, 4  ;;  %p79_p0 = scmp.ne.s32.totalorder %s162_s0, %s78_s10  ;;  %s15_s7 = int_to_ptr.vmem [resolvable:$true] %s14_s7 }
   0x3   :  { %p82_p1 = scmp.lt.u32.totalorder %s78_s10, %s162_s0 }
   0x5   :  { %p84_p2 = pnand %p82_p1, %p79_p0 }
   0x7   :  { %87 = shalt.err (!%p84_p2)
}
   0x8   :  { %s88_s15 = scalar_lea.vmem %s15_s7, 1024  ;;  %p93_p4 = scmp.lt.s32.totalorder %s15_s7, %s15_s7 }
   0x9   :  { %p89_p3 = scmp.ne.s32.totalorder %s15_s7, %s88_s15  ;;  %p94_p5 = scmp.lt.s32.totalorder %s88_s15, %s88_s15 }
   0xb   :  { %p95_p6 = por %p94_p5, %p93_p4 }
   0xd   :  { %p96_p7 = pnand %p95_p6, %p89_p3 }
   0xf   :  { %99 = shalt.err (!%p96_p7)
}
  0x10   :  { %17 = dma.hbm_to_vmem [thread:$0]  %s162_s0, 1024, %s15_s7, [#allocation3]  }
  0x11   :  { %122 = dma.done.wait [#allocation3], 1024  }
  0x12   :  { %123 = vsyncadd [#allocation3], 4294966272  ;;  %v21_v0 = vld [vmem:[#allocation2] sm:$0x3f]  ;;  %v22_v1 = vld [vmem:[#allocation2 + $0x8] sm:$0x3f] }
  0x13   :  { %v23_v2 = vld [vmem:[#allocation2 + $0x10] sm:$0x3f]  ;;  %vm29_vm0 = vcmp.gt.f32.partialorder %v21_v0, 0.0  ;;  %v37_v3 = vmul.f32 0.01, %v21_v0  ;;  %vm30_vm1 = vcmp.gt.f32.partialorder %v22_v1, 0.0 }
  0x14   :  { %v38_v4 = vmul.f32 0.01, %v22_v1  ;;  %vm31_vm2 = vcmp.gt.f32.partialorder %v23_v2, 0.0  ;;  %v39_v5 = vmul.f32 0.01, %v23_v2  ;;  %s127_s0 = smov [#allocation5]  }
  0x15   :  { %v24_v6 = vld [vmem:[#allocation2 + $0x18] sm:$0x3f]  ;;  %v45_v7 = vsel %vm29_vm0, %v21_v0, %v37_v3  ;;  %v25_v10 = vld [vmem:[#allocation2 + $0x20] sm:$0x3f]  ;;  %v26_v13 = vld [vmem:[#allocation2 + $0x28] sm:$0x3f] }
  0x16   :  { %v46_v8 = vsel %vm30_vm1, %v22_v1, %v38_v4  ;;  %vm32_vm3 = vcmp.gt.f32.partialorder %v24_v6, 0.0  ;;  %v40_v9 = vmul.f32 0.01, %v24_v6  ;;  %53 = vst [vmem:[#allocation5] sm:$0x3f] %v45_v7  ;;  %v47_v11 = vsel %vm31_vm2, %v23_v2, %v39_v5  ;;  %s67_s18 = sshll.u32 %s127_s0, 4  ;;  %s68_s18 = int_to_ptr.vmem [resolvable:$true] %s67_s18 }
  0x17   :  { %54 = vst [vmem:[#allocation5 + $0x8] sm:$0x3f] %v46_v8  ;;  %vm33_vm4 = vcmp.gt.f32.partialorder %v25_v10, 0.0  ;;  %v41_v12 = vmul.f32 0.01, %v25_v10  ;;  %vm34_vm5 = vcmp.gt.f32.partialorder %v26_v13, 0.0  ;;  %p105_p9 = scmp.lt.s32.totalorder %s68_s18, %s68_s18 }
  0x18   :  { %55 = vst [vmem:[#allocation5 + $0x10] sm:$0x3f] %v47_v11  ;;  %v48_v14 = vsel %vm32_vm3, %v24_v6, %v40_v9  ;;  %v42_v15 = vmul.f32 0.01, %v26_v13  ;;  %v27_v16 = vld [vmem:[#allocation2 + $0x30] sm:$0x3f] }
  0x19   :  { %56 = vst [vmem:[#allocation5 + $0x18] sm:$0x3f] %v48_v14  ;;  %v49_v17 = vsel %vm33_vm4, %v25_v10, %v41_v12  ;;  %vm35_vm6 = vcmp.gt.f32.partialorder %v27_v16, 0.0  ;;  %v43_v18 = vmul.f32 0.01, %v27_v16  ;;  %s100_s19 = scalar_lea.vmem %s68_s18, 1024 }
  0x1a   :  { %v28_v19 = vld [vmem:[#allocation2 + $0x38] sm:$0x3f]  ;;  %57 = vst [vmem:[#allocation5 + $0x20] sm:$0x3f] %v49_v17  ;;  %v50_v20 = vsel %vm34_vm5, %v26_v13, %v42_v15  ;;  %p101_p8 = scmp.ne.s32.totalorder %s68_s18, %s100_s19  ;;  %p106_p10 = scmp.lt.s32.totalorder %s100_s19, %s100_s19 }
  0x1b   :  { %vm36_vm7 = vcmp.gt.f32.partialorder %v28_v19, 0.0  ;;  %v44_v21 = vmul.f32 0.01, %v28_v19  ;;  %58 = vst [vmem:[#allocation5 + $0x28] sm:$0x3f] %v50_v20  ;;  %v51_v22 = vsel %vm35_vm6, %v27_v16, %v43_v18 }
  0x1c   :  { %59 = vst [vmem:[#allocation5 + $0x30] sm:$0x3f] %v51_v22  ;;  %p107_p11 = por %p106_p10, %p105_p9 }
  0x1d   :  { %v52_v23 = vsel %vm36_vm7, %v28_v19, %v44_v21 }
  0x1e   :  { %60 = vst [vmem:[#allocation5 + $0x38] sm:$0x3f] %v52_v23  ;;  %p108_p12 = pnand %p107_p11, %p101_p8 }
  0x20   :  { %111 = shalt.err (!%p108_p12)
}
  0x21   :  { %s112_s22 = scalar_lea.hbm %s163_s1, 1024 }
  0x22   :  { %p113_p13 = scmp.ne.s32.totalorder %s163_s1, %s112_s22  ;;  %p116_p0 = scmp.lt.u32.totalorder %s112_s22, %s163_s1 }
  0x24   :  { %p118_p1 = pnand %p116_p0, %p113_p13 }
  0x26   :  { %121 = shalt.err (!%p118_p1)
}
  0x27   :  { %70 = dma.vmem_to_hbm [thread:$0]  %s68_s18, 1024, %s163_s1, [#allocation4]  }
  0x28   :  { %124 = dma.done.wait [#allocation4], 1024  }
  0x29   :  { %125 = vsyncadd [#allocation4], 4294966272 }
  0x2a   :  { %74 = vsyncpa [#allocation3], 1 }
  0x2b   :  { %75 = vsyncpa [#allocation4], 1 }

</bundles_post_ra>
